<compile_context>
chip_gen: v7x
topology: tpu7x:2x2x1
jax: 0.10.0
libtpu: 0.0.40
codegen_flags: <defaults>
</compile_context>

<pallas_src>
import functools

import jax
import jax.numpy as jnp
from jax.experimental import pallas as pl
from jax.experimental.pallas import tpu as pltpu

# ---------------- model sizes (small, consistent with a VDVAE latent block) ------
B, C, H, W = 2, 4, 16, 16      # x: [2, 4, 16, 16] NCHW
HID = 32                        # hidden width of pointwise nets
Z = 8                           # latent channels
N = B * H * W                   # tokens on the lane axis: 512 = 4 * 128

# packed-slab row offsets (all multiples of 16 -> bf16 sublane-tile aligned)
R_W1 = 0                        # w1   : (HID, C)    rows  0:32
R_WMLV = HID                    # wmulv: (2Z, HID)   rows 32:48  (mu/logvar heads fused)
R_W2 = HID + 2 * Z              # w2   : (HID, Z)    rows 48:80
R_WOUT = 2 * HID + 2 * Z        # wout : (C, HID)    rows 80:84
R_TOT = 2 * HID + 2 * Z + C     # 84
OUT_ROWS = 3 * Z + C            # 28 : [mu(8); logvar(8); z(8); xhat(4)]


# ---------------- fused kernel ----------------------------------------------------
def fused_vdvae_kernel(x_ref,                      # (C, N)  f32, tokens on lanes
                       eps_ref,                    # (Z, N)  f32
                       w_ref,                      # (R_TOT, HID) bf16 packed weights
                       b_ref,                      # (R_TOT, 1)   f32  packed biases
                       out_ref,                    # (OUT_ROWS, N) f32 output slab
                       loss_ref=None,              # SMEM (2,) [recon_sum, kl_sum]
                       *, with_loss=True):
    x = x_ref[...]
    eps = eps_ref[...]

    def mm(wt, a):
        # bf16 MXU operands, f32 accumulation; elementwise math stays f32.
        return jnp.dot(wt, a.astype(jnp.bfloat16), preferred_element_type=jnp.float32)

    # ---- encoder: q(z|x) = (mu, logvar) ----
    w1 = w_ref[R_W1:R_W1 + HID, 0:C]
    b1 = b_ref[R_W1:R_W1 + HID, :]
    h = jax.nn.gelu(mm(w1, x) + b1, approximate=True)              # (HID, N)

    wmlv = w_ref[R_WMLV:R_WMLV + 2 * Z, 0:HID]                     # fused mu/lv heads
    bmlv = b_ref[R_WMLV:R_WMLV + 2 * Z, :]
    mulv = mm(wmlv, h) + bmlv                                      # (2Z, N)
    mu = mulv[0:Z, :]
    lv = mulv[Z:2 * Z, :]

    # ---- reparameterized sample ----
    z = mu + jnp.exp(0.5 * lv) * eps                               # (Z, N)

    # ---- decoder: p(x|z) mean ----
    w2 = w_ref[R_W2:R_W2 + HID, 0:Z]
    b2 = b_ref[R_W2:R_W2 + HID, :]
    h2 = jax.nn.gelu(mm(w2, z) + b2, approximate=True)             # (HID, N)

    wout = w_ref[R_WOUT:R_WOUT + C, 0:HID]
    bout = b_ref[R_WOUT:R_WOUT + C, :]
    xhat = mm(wout, h2) + bout                                     # (C, N)

    # single lane-dense (last dim = 512) output slab: one DMA, unmasked stores
    out_ref[0:Z, :] = mu
    out_ref[Z:2 * Z, :] = lv
    out_ref[2 * Z:3 * Z, :] = z
    out_ref[3 * Z:3 * Z + C, :] = xhat

    # ---- loss: recon sum-of-squares + KL(q || N(0,I)) -> SMEM scalars ----
    if with_loss:
        diff = x - xhat
        loss_ref[0] = jnp.sum(diff * diff)
        loss_ref[1] = jnp.sum(-0.5 * (1.0 + lv - mu * mu - jnp.exp(lv)))


# ---------------- pallas_call builders --------------------------------------------
def _build_call(with_loss):
    vmem = pl.BlockSpec(memory_space=pltpu.MemorySpace.VMEM)
    smem = pl.BlockSpec(memory_space=pltpu.MemorySpace.SMEM)
    slab = jax.ShapeDtypeStruct((OUT_ROWS, N), jnp.float32)
    if with_loss:
        out_shape = (slab, jax.ShapeDtypeStruct((2,), jnp.float32))
        out_specs = (vmem, smem)
    else:
        out_shape = slab
        out_specs = vmem
    return pl.pallas_call(
        functools.partial(fused_vdvae_kernel, with_loss=with_loss),
        out_shape=out_shape,
        in_specs=[vmem, vmem, vmem, vmem],
        out_specs=out_specs,
        # grid=(): single invocation; no tiling needed at these shapes.
    )


_CALL_WITH_LOSS = _build_call(True)
_CALL_NO_LOSS = _build_call(False)


# ---------------- param packing ----------------------------------------------------
def pack_params(enc_params, dec_params):
    """Pack 10 tiny weight/bias arrays into one bf16 weight slab + one f32 bias slab."""
    w1, b1, wmu, bmu, wlv, blv = enc_params
    w2, b2, wout, bout = dec_params

    def pad_cols(w):
        return jnp.pad(w, ((0, 0), (0, HID - w.shape[1])))

    w_slab = jnp.concatenate(
        [pad_cols(w1),
         pad_cols(jnp.concatenate([wmu, wlv], axis=0)),
         pad_cols(w2),
         pad_cols(wout)], axis=0).astype(jnp.bfloat16)        # (R_TOT, HID) bf16
    b_slab = jnp.concatenate(
        [b1, jnp.concatenate([bmu, blv], axis=0), b2, bout],
        axis=0).astype(jnp.float32)                           # (R_TOT, 1) f32
    return w_slab, b_slab


# ---------------- jitted wrappers (layout glue + kernel + loss normalization) ------
def _split_outputs(out_slab, b, h, w):
    def to_nchw(a_t):                                         # (K, N) -> (B, K, H, W)
        return a_t.reshape(a_t.shape[0], b, h, w).transpose(1, 0, 2, 3)
    return {
        "q_mu": to_nchw(out_slab[0:Z]),
        "q_logvar": to_nchw(out_slab[Z:2 * Z]),
        "z": to_nchw(out_slab[2 * Z:3 * Z]),
        "px_z": to_nchw(out_slab[3 * Z:3 * Z + C]),
    }


@jax.jit
def _forward_impl(x_nchw, key, w_slab, b_slab):
    b, c, h, w = x_nchw.shape
    x_t = x_nchw.transpose(1, 0, 2, 3).reshape(c, b * h * w)   # NCHW -> (C, N)
    eps = jax.random.normal(key, (Z, b * h * w), jnp.float32)
    out_slab, loss_sums = _CALL_WITH_LOSS(x_t, eps, w_slab, b_slab)
    out = _split_outputs(out_slab, b, h, w)
    recon = loss_sums[0] / jnp.float32(b)
    kl = loss_sums[1] / jnp.float32(b)
    return out, recon, kl


@jax.jit
def _latent_impl(x_nchw, key, w_slab, b_slab):
    b, c, h, w = x_nchw.shape
    x_t = x_nchw.transpose(1, 0, 2, 3).reshape(c, b * h * w)
    eps = jax.random.normal(key, (Z, b * h * w), jnp.float32)
    out_slab = _CALL_NO_LOSS(x_t, eps, w_slab, b_slab)
    return _split_outputs(out_slab, b, h, w)


# ---------------- Model (mirrors the PyTorch composition) --------------------------
class Model:
    def __init__(self, enc_params, dec_params):
        self.w_slab, self.b_slab = pack_params(enc_params, dec_params)

    def forward(self, data, **kwargs):
        key = data.get("rng_key", jax.random.PRNGKey(0))
        out, recon, kl = _forward_impl(data["x"], key, self.w_slab, self.b_slab)
        data.update(out)
        data["recon_loss"] = recon
        data["kl"] = kl
        # NOTE: "elbo" here is the total loss (negative ELBO), kept for dict parity.
        data["elbo"] = recon + kl
        return data

    def get_latent(self, data, **kwargs):
        key = data.get("rng_key", jax.random.PRNGKey(0))
        data.update(_latent_impl(data["x"], key, self.w_slab, self.b_slab))
        return data

    # TODO(synk): sample(N) requires the decoder's learned prior p(z) / loss.sample,
    # which are not part of this synthetic instantiation; unconditional sampling omitted.


# ---------------- deterministic param init + demo ----------------------------------
def init_params(key):
    ks = jax.random.split(key, 5)
    s = 0.1
    # weights stored pre-transposed for the (C, N) token-on-lane layout
    enc = (s * jax.random.normal(ks[0], (HID, C), jnp.float32),   # W1^T
           jnp.zeros((HID, 1), jnp.float32),
           s * jax.random.normal(ks[1], (Z, HID), jnp.float32),   # Wmu^T
           jnp.zeros((Z, 1), jnp.float32),
           s * jax.random.normal(ks[2], (Z, HID), jnp.float32),   # Wlv^T
           jnp.zeros((Z, 1), jnp.float32))
    dec = (s * jax.random.normal(ks[3], (HID, Z), jnp.float32),   # W2^T
           jnp.zeros((HID, 1), jnp.float32),
           s * jax.random.normal(ks[4], (C, HID), jnp.float32),   # Wout^T
           jnp.zeros((C, 1), jnp.float32))
    return enc, dec


if __name__ == "__main__":
    key = jax.random.PRNGKey(0)
    kx, kp, ke = jax.random.split(key, 3)

    x_nchw = jax.random.normal(kx, (B, C, H, W), jnp.float32)     # PyTorch NCHW input
    enc_params, dec_params = init_params(kp)
    model = Model(enc_params, dec_params)

    data = {"x": x_nchw, "rng_key": ke}
    out = model.forward(data)
    jax.block_until_ready((out["px_z"], out["z"], out["elbo"],
                           out["kl"], out["recon_loss"]))
    print("KERNEL_OK")
</pallas_src>

<mosaic_0001>
module attributes {stable_mosaic.version = 11 : i64} {
  func.func @fused_vdvae_kernel(%arg0: memref<4x512xf32, #tpu.memory_space<vmem>>, %arg1: memref<8x512xf32, #tpu.memory_space<vmem>>, %arg2: memref<84x32xbf16, #tpu.memory_space<vmem>>, %arg3: memref<84x1xf32, #tpu.memory_space<vmem>>, %arg4: memref<28x512xf32, #tpu.memory_space<vmem>>, %arg5: memref<2xf32, #tpu.memory_space<smem>>) attributes {dimension_semantics = [], scalar_prefetch = 0 : i64, scratch_operands = 0 : i64, tpu.core_type = #tpu.core_type<tc>} {
    %c0 = arith.constant 0 : index
    %c0_0 = arith.constant 0 : index
    %0 = vector.load %arg0[%c0, %c0_0] : memref<4x512xf32, #tpu.memory_space<vmem>>, vector<4x512xf32>
    %c0_1 = arith.constant 0 : index
    %c0_2 = arith.constant 0 : index
    %1 = vector.load %arg1[%c0_1, %c0_2] : memref<8x512xf32, #tpu.memory_space<vmem>>, vector<8x512xf32>
    %c0_3 = arith.constant 0 : index
    %c0_4 = arith.constant 0 : index
    %2 = vector.load %arg2[%c0_3, %c0_4] : memref<84x32xbf16, #tpu.memory_space<vmem>>, vector<32x4xbf16>
    %c0_5 = arith.constant 0 : index
    %c0_6 = arith.constant 0 : index
    %3 = vector.load %arg3[%c0_5, %c0_6] : memref<84x1xf32, #tpu.memory_space<vmem>>, vector<32x1xf32>
    %4 = arith.truncf %0 : vector<4x512xf32> to vector<4x512xbf16>
    %cst = arith.constant dense<0.000000e+00> : vector<32x512xf32>
    %5 = tpu.matmul %2, %4, %cst {dimension_numbers = #tpu.dot_dimension_numbers<[1], [0], [0], [1], [0, 0, 1, 1], [], []>} : vector<32x4xbf16>, vector<4x512xbf16>, vector<32x512xf32> -> vector<32x512xf32>
    %6 = vector.broadcast %3 : vector<32x1xf32> to vector<32x512xf32>
    %7 = arith.addf %5, %6 : vector<32x512xf32>
    %8 = arith.mulf %7, %7 : vector<32x512xf32>
    %9 = arith.mulf %7, %8 : vector<32x512xf32>
    %cst_7 = arith.constant 4.471500e-02 : f32
    %10 = vector.broadcast %cst_7 : f32 to vector<32x512xf32>
    %11 = arith.mulf %10, %9 : vector<32x512xf32>
    %12 = arith.addf %7, %11 : vector<32x512xf32>
    %cst_8 = arith.constant 0.797884583 : f32
    %13 = vector.broadcast %cst_8 : f32 to vector<32x512xf32>
    %14 = arith.mulf %13, %12 : vector<32x512xf32>
    %15 = math.tanh %14 : vector<32x512xf32>
    %cst_9 = arith.constant 1.000000e+00 : f32
    %16 = vector.broadcast %cst_9 : f32 to vector<32x512xf32>
    %17 = arith.addf %16, %15 : vector<32x512xf32>
    %cst_10 = arith.constant 5.000000e-01 : f32
    %18 = vector.broadcast %cst_10 : f32 to vector<32x512xf32>
    %19 = arith.mulf %18, %17 : vector<32x512xf32>
    %20 = arith.mulf %7, %19 : vector<32x512xf32>
    %c32 = arith.constant 32 : index
    %c0_11 = arith.constant 0 : index
    %21 = vector.load %arg2[%c32, %c0_11] : memref<84x32xbf16, #tpu.memory_space<vmem>>, vector<16x32xbf16>
    %c32_12 = arith.constant 32 : index
    %c0_13 = arith.constant 0 : index
    %22 = vector.load %arg3[%c32_12, %c0_13] : memref<84x1xf32, #tpu.memory_space<vmem>>, vector<16x1xf32>
    %23 = arith.truncf %20 : vector<32x512xf32> to vector<32x512xbf16>
    %cst_14 = arith.constant dense<0.000000e+00> : vector<16x512xf32>
    %24 = tpu.matmul %21, %23, %cst_14 {dimension_numbers = #tpu.dot_dimension_numbers<[1], [0], [0], [1], [0, 0, 1, 1], [], []>} : vector<16x32xbf16>, vector<32x512xbf16>, vector<16x512xf32> -> vector<16x512xf32>
    %25 = vector.broadcast %22 : vector<16x1xf32> to vector<16x512xf32>
    %26 = arith.addf %24, %25 : vector<16x512xf32>
    %27 = vector.extract_strided_slice %26 {offsets = [0, 0], sizes = [8, 512], strides = [1, 1]} : vector<16x512xf32> to vector<8x512xf32>
    %28 = vector.extract_strided_slice %26 {offsets = [8, 0], sizes = [8, 512], strides = [1, 1]} : vector<16x512xf32> to vector<8x512xf32>
    %cst_15 = arith.constant 5.000000e-01 : f32
    %29 = vector.broadcast %cst_15 : f32 to vector<8x512xf32>
    %30 = arith.mulf %29, %28 : vector<8x512xf32>
    %31 = math.exp %30 : vector<8x512xf32>
    %32 = arith.mulf %31, %1 : vector<8x512xf32>
    %33 = arith.addf %27, %32 : vector<8x512xf32>
    %c48 = arith.constant 48 : index
    %c0_16 = arith.constant 0 : index
    %34 = vector.load %arg2[%c48, %c0_16] : memref<84x32xbf16, #tpu.memory_space<vmem>>, vector<32x8xbf16>
    %c48_17 = arith.constant 48 : index
    %c0_18 = arith.constant 0 : index
    %35 = vector.load %arg3[%c48_17, %c0_18] : memref<84x1xf32, #tpu.memory_space<vmem>>, vector<32x1xf32>
    %36 = arith.truncf %33 : vector<8x512xf32> to vector<8x512xbf16>
    %cst_19 = arith.constant dense<0.000000e+00> : vector<32x512xf32>
    %37 = tpu.matmul %34, %36, %cst_19 {dimension_numbers = #tpu.dot_dimension_numbers<[1], [0], [0], [1], [0, 0, 1, 1], [], []>} : vector<32x8xbf16>, vector<8x512xbf16>, vector<32x512xf32> -> vector<32x512xf32>
    %38 = vector.broadcast %35 : vector<32x1xf32> to vector<32x512xf32>
    %39 = arith.addf %37, %38 : vector<32x512xf32>
    %40 = arith.mulf %39, %39 : vector<32x512xf32>
    %41 = arith.mulf %39, %40 : vector<32x512xf32>
    %cst_20 = arith.constant 4.471500e-02 : f32
    %42 = vector.broadcast %cst_20 : f32 to vector<32x512xf32>
    %43 = arith.mulf %42, %41 : vector<32x512xf32>
    %44 = arith.addf %39, %43 : vector<32x512xf32>
    %cst_21 = arith.constant 0.797884583 : f32
    %45 = vector.broadcast %cst_21 : f32 to vector<32x512xf32>
    %46 = arith.mulf %45, %44 : vector<32x512xf32>
    %47 = math.tanh %46 : vector<32x512xf32>
    %cst_22 = arith.constant 1.000000e+00 : f32
    %48 = vector.broadcast %cst_22 : f32 to vector<32x512xf32>
    %49 = arith.addf %48, %47 : vector<32x512xf32>
    %cst_23 = arith.constant 5.000000e-01 : f32
    %50 = vector.broadcast %cst_23 : f32 to vector<32x512xf32>
    %51 = arith.mulf %50, %49 : vector<32x512xf32>
    %52 = arith.mulf %39, %51 : vector<32x512xf32>
    %c80 = arith.constant 80 : index
    %c0_24 = arith.constant 0 : index
    %53 = vector.load %arg2[%c80, %c0_24] : memref<84x32xbf16, #tpu.memory_space<vmem>>, vector<4x32xbf16>
    %c80_25 = arith.constant 80 : index
    %c0_26 = arith.constant 0 : index
    %54 = vector.load %arg3[%c80_25, %c0_26] : memref<84x1xf32, #tpu.memory_space<vmem>>, vector<4x1xf32>
    %55 = arith.truncf %52 : vector<32x512xf32> to vector<32x512xbf16>
    %cst_27 = arith.constant dense<0.000000e+00> : vector<4x512xf32>
    %56 = tpu.matmul %53, %55, %cst_27 {dimension_numbers = #tpu.dot_dimension_numbers<[1], [0], [0], [1], [0, 0, 1, 1], [], []>} : vector<4x32xbf16>, vector<32x512xbf16>, vector<4x512xf32> -> vector<4x512xf32>
    %57 = vector.broadcast %54 : vector<4x1xf32> to vector<4x512xf32>
    %58 = arith.addf %56, %57 : vector<4x512xf32>
    %c0_28 = arith.constant 0 : index
    %c0_29 = arith.constant 0 : index
    %59 = vector.load %arg4[%c0_28, %c0_29] : memref<28x512xf32, #tpu.memory_space<vmem>>, vector<8x512xf32>
    tpu.vector_store %arg4[%c0_28, %c0_29], %27 {strides = array<i32>} : memref<28x512xf32, #tpu.memory_space<vmem>>, vector<8x512xf32>,
    %c8 = arith.constant 8 : index
    %c0_30 = arith.constant 0 : index
    %60 = vector.load %arg4[%c8, %c0_30] : memref<28x512xf32, #tpu.memory_space<vmem>>, vector<8x512xf32>
    tpu.vector_store %arg4[%c8, %c0_30], %28 {strides = array<i32>} : memref<28x512xf32, #tpu.memory_space<vmem>>, vector<8x512xf32>,
    %c16 = arith.constant 16 : index
    %c0_31 = arith.constant 0 : index
    %61 = vector.load %arg4[%c16, %c0_31] : memref<28x512xf32, #tpu.memory_space<vmem>>, vector<8x512xf32>
    tpu.vector_store %arg4[%c16, %c0_31], %33 {strides = array<i32>} : memref<28x512xf32, #tpu.memory_space<vmem>>, vector<8x512xf32>,
    %c24 = arith.constant 24 : index
    %c0_32 = arith.constant 0 : index
    %62 = vector.load %arg4[%c24, %c0_32] : memref<28x512xf32, #tpu.memory_space<vmem>>, vector<4x512xf32>
    tpu.vector_store %arg4[%c24, %c0_32], %58 {strides = array<i32>} : memref<28x512xf32, #tpu.memory_space<vmem>>, vector<4x512xf32>,
    %63 = arith.subf %0, %58 : vector<4x512xf32>
    %64 = arith.mulf %63, %63 : vector<4x512xf32>
    %65 = vector.shape_cast %64 : vector<4x512xf32> to vector<1x4x512xf32>
    %cst_33 = arith.constant dense<0.000000e+00> : vector<1xf32>
    %66 = vector.multi_reduction <add>, %65, %cst_33 [1, 2] : vector<1x4x512xf32> to vector<1xf32>
    %67 = vector.shape_cast %66 : vector<1xf32> to vector<1x1x1xf32>
    %68 = vector.extract %67[0, 0, 0] : f32 from vector<1x1x1xf32>
    %c0_34 = arith.constant 0 : index
    %69 = memref.load %arg5[%c0_34] : memref<2xf32, #tpu.memory_space<smem>>
    memref.store %68, %arg5[%c0_34] : memref<2xf32, #tpu.memory_space<smem>>
    %cst_35 = arith.constant 1.000000e+00 : f32
    %70 = vector.broadcast %cst_35 : f32 to vector<8x512xf32>
    %71 = arith.addf %70, %28 : vector<8x512xf32>
    %72 = arith.mulf %27, %27 : vector<8x512xf32>
    %73 = arith.subf %71, %72 : vector<8x512xf32>
    %74 = math.exp %28 : vector<8x512xf32>
    %75 = arith.subf %73, %74 : vector<8x512xf32>
    %cst_36 = arith.constant -5.000000e-01 : f32
    %76 = vector.broadcast %cst_36 : f32 to vector<8x512xf32>
    %77 = arith.mulf %76, %75 : vector<8x512xf32>
    %78 = vector.shape_cast %77 : vector<8x512xf32> to vector<1x8x512xf32>
    %cst_37 = arith.constant dense<0.000000e+00> : vector<1xf32>
    %79 = vector.multi_reduction <add>, %78, %cst_37 [1, 2] : vector<1x8x512xf32> to vector<1xf32>
    %80 = vector.shape_cast %79 : vector<1xf32> to vector<1x1x1xf32>
    %81 = vector.extract %80[0, 0, 0] : f32 from vector<1x1x1xf32>
    %c1 = arith.constant 1 : index
    %82 = memref.load %arg5[%c1] : memref<2xf32, #tpu.memory_space<smem>>
    memref.store %81, %arg5[%c1] : memref<2xf32, #tpu.memory_space<smem>>
    return
  }
}

</mosaic_0001>

<bundles_post_ra>
// kernel: _forward_impl.1
= control target key start
LH: loop header
LB: loop body
LE: loop exit
PB: predicated region body
PF: predicated region fallthrough
CT: control target
= control target key end

     0   :  { %vm82_vm0 = vcmask 1041408   ;;  %v1139_v6 = vmov 0   ;;  %vm75_vm1 = vcmask 31744   ;;  %s1583_s0 = inlined_call_operand.vmem [shape: f32[4,512], index: 0, kind: input, shape index: {}]   ;;  %s1584_s1 = inlined_call_operand.vmem [shape: f32[8,512], index: 1, kind: input, shape index: {}]   ;;  %s1585_s2 = inlined_call_operand.vmem [shape: bf16[84,32], index: 2, kind: input, shape index: {}]   ;;  %s1586_s3 = inlined_call_operand.vmem [shape: f32[84,1], index: 3, kind: input, shape index: {}]   ;;  %s1587_s4 = inlined_call_operand.vmem [shape: f32[28,512], index: 4, kind: output, shape index: {0}]   ;;  %s1588_s5 = inlined_call_operand.vmem [shape: f32[2], index: 5, kind: output, shape index: {1}]  }
   0x1   :  { %v21_v0 = vld [vmem:[%s1583_s0] sm:$0xff]  ;;  %v22_v1 = vld [vmem:[%s1583_s0 + $0x8] sm:$0xff]  ;;  %127 = vmatprep.mubr.bf16.mxu0 %v1139_v6  ;;  %180 = vmatprep.mubr.bf16.mxu1 %v1139_v6  ;;  %v33_v12 = vld [vmem:[%s1586_s3 + $0x10] sm:$0xff] }
   0x2   :  { %v37_v2 = vcombine.high %v21_v0, %v21_v0  ;;  %v38_v3 = vcombine.high %v22_v1, %v22_v1  ;;  %v41_v4 = vpack.c.bf16 %v21_v0, %v21_v0  ;;  %v43_v5 = vpack.c.bf16 %v22_v1, %v22_v1  ;;  %1034 = vset.pattern.permute.xlu0 %v1139_v6  ;;  %v31_v7 = vld [vmem:[%s1586_s3] sm:$0xff]  ;;  %v32_v13 = vld [vmem:[%s1586_s3 + $0x8] sm:$0xff]  ;;  %v34_v15 = vld [vmem:[%s1586_s3 + $0x18] sm:$0xff] }
   0x3   :  { %47 = vperm.xlu0 %1034, %v31_v7   ;;  %1035 = vset.pattern.permute.xlu1 %v1139_v6  ;;  %v1038_v14 = vld [vmem:[%s1585_s2] sm:$0xff]   ;;  %v348_v16 = vld [vmem:[%s1586_s3 + $0x28] sm:$0xff] }
   0x4   :  { %v42_v8 = vpack.c.bf16 %v37_v2, %v37_v2  ;;  %v44_v9 = vpack.c.bf16 %v38_v3, %v38_v3  ;;  %v84_v10 = vsel %vm82_vm0, %v41_v4, 0  ;;  %v90_v11 = vsel %vm82_vm0, %v43_v5, 0  ;;  %57 = vperm.xlu1 %1035, %v33_v12  }
   0x6   :  { %1009 = vmatprep.subr.msk.bf16.mxu0 %vm82_vm0, %v42_v8  ;;  %1012 = vmatprep.subr.msk.bf16.mxu1 %vm82_vm0, %v44_v9 }
   0x7   :  { %96 = vmatpush1.bf16.msra.mxu0 %v84_v10  ;;  %149 = vmatpush1.bf16.msra.mxu1 %v90_v11 }
   0x8   :  { %52 = vperm.xlu0 %1034, %v32_v13   ;;  %62 = vperm.xlu1 %1035, %v34_v15  }
   0x9   :  { %11 = vsyncpa [#allocation3], 0  ;;  %v347_v17 = vld [vmem:[%s1586_s3 + $0x20] sm:$0xff]  ;;  %v486_v18 = vld [vmem:[%s1586_s3 + $0x30] sm:$0xff]  ;;  %vm372_vm2 = vcmask 261120   ;;  %vm531_vm3 = vcmask 1043456  }
   0xa   :  { %1010 = vmatmul.mubr.msk.bf16.vlgmr.msra.gmra.mrb[0].mxu0 %vm75_vm1, %v1038_v14  ;;  %1013 = vmatmul.mubr.msk.bf16.vlgmr.msra.gmra.mrb[0].mxu1 %vm75_vm1, %v1038_v14  ;;  %v1039_v19 = vld [vmem:[%s1585_s2 + $0x8] sm:$0xff]   ;;  %v487_v20 = vld [vmem:[%s1586_s3 + $0x38] sm:$0xff]  ;;  %v488_v21 = vld [vmem:[%s1586_s3 + $0x40] sm:$0xff]  ;;  %vm524_vm4 = vcmask 64512   ;;  %s996_s21 = sshll.u32 %s1588_s5, 4  ;;  %s997_s21 = int_to_ptr.vmem [resolvable:$true] %s996_s21 }
   0xb   :  { %137 = vmatprep.mubr.bf16.mxu0 %v1139_v6  ;;  %190 = vmatprep.mubr.bf16.mxu1 %v1139_v6  ;;  %v489_v22 = vld [vmem:[%s1586_s3 + $0x48] sm:$0xff]  ;;  %v795_v23 = vld [vmem:[%s1586_s3 + $0x50] sm:$0xf]  ;;  %s1125_s23 = scalar_lea.vmem %s997_s21, 16  ;;  %p1130_p1 = scmp.lt.s32.totalorder %s997_s21, %s997_s21 }
   0xc   :  { %364 = vperm.xlu0 %1034, %v348_v16   ;;  %359 = vperm.xlu1 %1035, %v347_v17   ;;  %p1126_p0 = scmp.ne.s32.totalorder %s997_s21, %s1125_s23  ;;  %p1131_p2 = scmp.lt.s32.totalorder %s1125_s23, %s1125_s23 }
   0xe   :  { %p1132_p3 = por %p1131_p2, %p1130_p1 }
  0x10   :  { %496 = vperm.xlu0 %1034, %v486_v18   ;;  %501 = vperm.xlu1 %1035, %v487_v20   ;;  %p1133_p4 = pnand %p1132_p3, %p1126_p0 }
  0x12   :  { %1011 = vmatmul.mubr.msk.bf16.gmra.mrb[4].mxu0 %vm75_vm1, %v1039_v19  ;;  %1014 = vmatmul.mubr.msk.bf16.gmra.mrb[4].mxu1 %vm75_vm1, %v1039_v19 }
  0x13   :  { %408 = vmatprep.mubr.bf16.mxu0 %v1139_v6  ;;  %451 = vmatprep.mubr.bf16.mxu1 %v1139_v6 }
  0x14   :  { %506 = vperm.xlu0 %1034, %v488_v21   ;;  %511 = vperm.xlu1 %1035, %v489_v22  }
  0x18   :  { %806 = vperm.xlu0 %1034, %v795_v23  }
  0x82   :  { %v48_v24 = vpop.permute.xlu0 %47 }
  0x83   :  { %v58_v54 = vpop.permute.xlu1 %57 }
  0x87   :  { %v53_v25 = vpop.permute.xlu0 %52 }
  0xdd   :  { %v129_v26 = vpop.f32.mrb[0].mxu0  ;;  %v182_v27 = vpop.f32.mrb[0].mxu1 }
  0xde   :  { %v1232_v28 = vadd.f32 %v129_v26, %v48_v24  ;;  %v1234_v29 = vadd.f32 %v182_v27, %v48_v24  ;;  %v131_v30 = vpop.f32.mrb[1].mxu0  ;;  %v184_v31 = vpop.f32.mrb[1].mxu1 }
  0xdf   :  { %v1236_v32 = vadd.f32 %v131_v30, %v48_v24  ;;  %v1238_v33 = vadd.f32 %v184_v31, %v48_v24  ;;  %v133_v34 = vpop.f32.mrb[2].mxu0  ;;  %v186_v35 = vpop.f32.mrb[2].mxu1 }
  0xe0   :  { %v201_v36 = vmul.f32 %v1232_v28, %v1232_v28  ;;  %v203_v37 = vmul.f32 %v1234_v29, %v1234_v29  ;;  %v1244_v38 = vadd.f32 %v133_v34, %v53_v25  ;;  %v1246_v39 = vadd.f32 %v186_v35, %v53_v25  ;;  %v135_v40 = vpop.f32.mrb[3].mxu0  ;;  %v188_v41 = vpop.f32.mrb[3].mxu1 }
  0xe1   :  { %v202_v42 = vmul.f32 %v1236_v32, %v1236_v32  ;;  %v204_v43 = vmul.f32 %v1238_v33, %v1238_v33  ;;  %v1252_v44 = vadd.f32 %v135_v40, %v53_v25  ;;  %v1254_v45 = vadd.f32 %v188_v41, %v53_v25  ;;  %v63_v34 = vpop.permute.xlu1 %62 }
  0xe2   :  { %v217_v46 = vmul.f32 %v201_v36, %v1232_v28  ;;  %v219_v47 = vmul.f32 %v203_v37, %v1234_v29  ;;  %v205_v48 = vmul.f32 %v1244_v38, %v1244_v38  ;;  %v207_v49 = vmul.f32 %v1246_v39, %v1246_v39 }
  0xe3   :  { %v218_v50 = vmul.f32 %v202_v42, %v1236_v32  ;;  %v220_v51 = vmul.f32 %v204_v43, %v1238_v33  ;;  %v206_v52 = vmul.f32 %v1252_v44, %v1252_v44  ;;  %v208_v53 = vmul.f32 %v1254_v45, %v1254_v45 }
  0xe4   :  { %v233_v55 = vmul.f32 0.044715, %v217_v46  ;;  %v235_v56 = vmul.f32 0.044715, %v219_v47  ;;  %v221_v57 = vmul.f32 %v205_v48, %v1244_v38  ;;  %v223_v58 = vmul.f32 %v207_v49, %v1246_v39 }
  0xe5   :  { %v234_v59 = vmul.f32 0.044715, %v218_v50  ;;  %v236_v60 = vmul.f32 0.044715, %v220_v51  ;;  %v222_v61 = vmul.f32 %v206_v52, %v1252_v44  ;;  %v224_v62 = vmul.f32 %v208_v53, %v1254_v45  ;;  %v139_v63 = vpop.f32.mrb[4].mxu0  ;;  %v192_v0 = vpop.f32.mrb[4].mxu1 }
  0xe6   :  { %v249_v1 = vadd.f32 %v233_v55, %v1232_v28  ;;  %v251_v2 = vadd.f32 %v235_v56, %v1234_v29  ;;  %v237_v3 = vmul.f32 0.044715, %v221_v57  ;;  %v239_v4 = vmul.f32 0.044715, %v223_v58  ;;  %v141_v5 = vpop.f32.mrb[5].mxu0  ;;  %v194_v7 = vpop.f32.mrb[5].mxu1 }
  0xe7   :  { %v250_v8 = vadd.f32 %v234_v59, %v1236_v32  ;;  %v252_v9 = vadd.f32 %v236_v60, %v1238_v33  ;;  %v238_v10 = vmul.f32 0.044715, %v222_v61  ;;  %v240_v11 = vmul.f32 0.044715, %v224_v62  ;;  %v143_v12 = vpop.f32.mrb[6].mxu0  ;;  %v196_v13 = vpop.f32.mrb[6].mxu1 }
  0xe8   :  { %v265_v14 = vmul.f32 0.7978846, %v249_v1  ;;  %v267_v15 = vmul.f32 0.7978846, %v251_v2  ;;  %v253_v16 = vadd.f32 %v237_v3, %v1244_v38  ;;  %v255_v17 = vadd.f32 %v239_v4, %v1246_v39  ;;  %v145_v18 = vpop.f32.mrb[7].mxu0  ;;  %v198_v19 = vpop.f32.mrb[7].mxu1 }
  0xe9   :  { %v266_v20 = vmul.f32 0.7978846, %v250_v8  ;;  %v268_v21 = vmul.f32 0.7978846, %v252_v9  ;;  %v254_v22 = vadd.f32 %v238_v10, %v1252_v44  ;;  %v256_v23 = vadd.f32 %v240_v11, %v1254_v45 }
  0xea   :  { %1043 = vtanh.f32 %v265_v14  ;;  %v269_v24 = vmul.f32 0.7978846, %v253_v16  ;;  %v271_v25 = vmul.f32 0.7978846, %v255_v17  ;;  %v1280_v26 = vadd.f32 %v139_v63, %v58_v54 }
  0xeb   :  { %1045 = vtanh.f32 %v267_v15  ;;  %v270_v27 = vmul.f32 0.7978846, %v254_v22  ;;  %v272_v30 = vmul.f32 0.7978846, %v256_v23  ;;  %v1282_v31 = vadd.f32 %v192_v0, %v58_v54 }
  0xec   :  { %1047 = vtanh.f32 %v266_v20  ;;  %v209_v35 = vmul.f32 %v1280_v26, %v1280_v26  ;;  %v1286_v36 = vadd.f32 %v141_v5, %v58_v54  ;;  %v1288_v37 = vadd.f32 %v194_v7, %v58_v54 }
  0xed   :  { %1049 = vtanh.f32 %v268_v21  ;;  %v211_v40 = vmul.f32 %v1282_v31, %v1282_v31  ;;  %v1292_v41 = vadd.f32 %v143_v12, %v63_v34  ;;  %v1294_v42 = vadd.f32 %v196_v13, %v63_v34 }
  0xee   :  { %1051 = vtanh.f32 %v269_v24  ;;  %v225_v43 = vmul.f32 %v209_v35, %v1280_v26  ;;  %v210_v46 = vmul.f32 %v1286_v36, %v1286_v36  ;;  %v212_v47 = vmul.f32 %v1288_v37, %v1288_v37 }
  0xef   :  { %1053 = vtanh.f32 %v271_v25  ;;  %v227_v48 = vmul.f32 %v211_v40, %v1282_v31  ;;  %v213_v49 = vmul.f32 %v1292_v41, %v1292_v41  ;;  %v215_v50 = vmul.f32 %v1294_v42, %v1294_v42 }
  0xf0   :  { %1055 = vtanh.f32 %v270_v27  ;;  %v241_v51 = vmul.f32 0.044715, %v225_v43  ;;  %v226_v52 = vmul.f32 %v210_v46, %v1286_v36  ;;  %v228_v53 = vmul.f32 %v212_v47, %v1288_v37 }
  0xf1   :  { %1057 = vtanh.f32 %v272_v30  ;;  %v243_v54 = vmul.f32 0.044715, %v227_v48  ;;  %v229_v55 = vmul.f32 %v213_v49, %v1292_v41  ;;  %v231_v56 = vmul.f32 %v215_v50, %v1294_v42 }
  0xf2   :  { %v257_v57 = vadd.f32 %v241_v51, %v1280_v26  ;;  %v242_v58 = vmul.f32 0.044715, %v226_v52  ;;  %v244_v59 = vmul.f32 0.044715, %v228_v53  ;;  %v1311_v60 = vadd.f32 %v145_v18, %v63_v34 }
  0xf3   :  { %v259_v61 = vadd.f32 %v243_v54, %v1282_v31  ;;  %v245_v62 = vmul.f32 0.044715, %v229_v55  ;;  %v247_v63 = vmul.f32 0.044715, %v231_v56  ;;  %v1314_v0 = vadd.f32 %v198_v19, %v63_v34 }
  0xf4   :  { %v1044_v1 = vpop.eup %1043  ;;  %v273_v2 = vmul.f32 0.7978846, %v257_v57  ;;  %v258_v3 = vadd.f32 %v242_v58, %v1286_v36  ;;  %v260_v4 = vadd.f32 %v244_v59, %v1288_v37  ;;  %v214_v5 = vmul.f32 %v1311_v60, %v1311_v60 }
  0xf5   :  { %v1046_v7 = vpop.eup %1045  ;;  %v297_v8 = vadd.f32 1.0, %v1044_v1  ;;  %v275_v9 = vmul.f32 0.7978846, %v259_v61  ;;  %v261_v10 = vadd.f32 %v245_v62, %v1292_v41  ;;  %v263_v11 = vadd.f32 %v247_v63, %v1294_v42 }
  0xf6   :  { %v1048_v12 = vpop.eup %1047  ;;  %v299_v13 = vadd.f32 1.0, %v1046_v7  ;;  %1059 = vtanh.f32 %v273_v2  ;;  %v274_v14 = vmul.f32 0.7978846, %v258_v3  ;;  %v276_v15 = vmul.f32 0.7978846, %v260_v4 }
  0xf7   :  { %v1050_v16 = vpop.eup %1049  ;;  %v313_v17 = vmul.f32 0.5, %v297_v8  ;;  %1061 = vtanh.f32 %v275_v9  ;;  %v277_v18 = vmul.f32 0.7978846, %v261_v10  ;;  %v279_v19 = vmul.f32 0.7978846, %v263_v11 }
  0xf8   :  { %v1052_v20 = vpop.eup %1051  ;;  %v315_v21 = vmul.f32 0.5, %v299_v13  ;;  %1063 = vtanh.f32 %v274_v14  ;;  %v230_v22 = vmul.f32 %v214_v5, %v1311_v60  ;;  %v216_v23 = vmul.f32 %v1314_v0, %v1314_v0 }
  0xf9   :  { %v1054_v24 = vpop.eup %1053  ;;  %v329_v25 = vmul.f32 %v313_v17, %v1232_v28  ;;  %v301_v27 = vadd.f32 1.0, %v1052_v20  ;;  %1065 = vtanh.f32 %v276_v15  ;;  %v298_v30 = vadd.f32 1.0, %v1048_v12 }
  0xfa   :  { %v1056_v34 = vpop.eup %1055  ;;  %v331_v35 = vmul.f32 %v315_v21, %v1234_v29  ;;  %v303_v40 = vadd.f32 1.0, %v1054_v24  ;;  %1067 = vtanh.f32 %v277_v18  ;;  %v246_v43 = vmul.f32 0.044715, %v230_v22 }
  0xfb   :  { %v1058_v46 = vpop.eup %1057  ;;  %v317_v47 = vmul.f32 0.5, %v301_v27  ;;  %1069 = vtanh.f32 %v279_v19  ;;  %v232_v48 = vmul.f32 %v216_v23, %v1314_v0  ;;  %v302_v49 = vadd.f32 1.0, %v1056_v34 }
  0xfc   :  { %v319_v50 = vmul.f32 0.5, %v303_v40  ;;  %v262_v51 = vadd.f32 %v246_v43, %v1311_v60  ;;  %v314_v52 = vmul.f32 0.5, %v298_v30  ;;  %v300_v28 = vadd.f32 1.0, %v1050_v16 }
  0xfd   :  { %v333_v53 = vmul.f32 %v317_v47, %v1244_v38  ;;  %v248_v54 = vmul.f32 0.044715, %v232_v48  ;;  %v318_v55 = vmul.f32 0.5, %v302_v49  ;;  %v304_v56 = vadd.f32 1.0, %v1058_v46 }
  0xfe   :  { %v335_v29 = vmul.f32 %v319_v50, %v1246_v39  ;;  %v278_v57 = vmul.f32 0.7978846, %v262_v51  ;;  %v330_v58 = vmul.f32 %v314_v52, %v1236_v32  ;;  %v316_v59 = vmul.f32 0.5, %v300_v28  ;;  %v365_v50 = vpop.permute.xlu0 %364 }
  0xff   :  { %v264_v61 = vadd.f32 %v248_v54, %v1314_v0  ;;  %v334_v62 = vmul.f32 %v318_v55, %v1252_v44  ;;  %v320_v63 = vmul.f32 0.5, %v304_v56  ;;  %v349_v1 = vpack.c.bf16 %v333_v53, %v329_v25 }
 0x100   :  { %v1060_v2 = vpop.eup %1059  ;;  %1071 = vtanh.f32 %v278_v57  ;;  %v332_v3 = vmul.f32 %v316_v59, %v1238_v33  ;;  %v351_v38 = vpack.c.bf16 %v335_v29, %v331_v35 }
 0x101   :  { %v1062_v4 = vpop.eup %1061  ;;  %v305_v5 = vadd.f32 1.0, %v1060_v2  ;;  %v280_v7 = vmul.f32 0.7978846, %v264_v61  ;;  %v350_v8 = vpack.c.bf16 %v334_v62, %v330_v58  ;;  %v336_v39 = vmul.f32 %v320_v63, %v1254_v45 }
 0x102   :  { %v1064_v9 = vpop.eup %1063  ;;  %v307_v32 = vadd.f32 1.0, %v1062_v4 }
 0x103   :  { %v1066_v10 = vpop.eup %1065  ;;  %1073 = vtanh.f32 %v280_v7  ;;  %376 = vmatprep.subr.bf16.mxu0 %v350_v8  ;;  %v352_v11 = vpack.c.bf16 %v336_v39, %v332_v3  ;;  %v321_v13 = vmul.f32 0.5, %v305_v5  ;;  %v306_v17 = vadd.f32 1.0, %v1064_v9 }
 0x104   :  { %v1068_v44 = vpop.eup %1067  ;;  %377 = vmatpush1.bf16.msra.mxu0 %v349_v1  ;;  %v323_v33 = vmul.f32 0.5, %v307_v32  ;;  %v308_v23 = vadd.f32 1.0, %v1066_v10 }
 0x105   :  { %v1070_v12 = vpop.eup %1069  ;;  %v309_v14 = vadd.f32 1.0, %v1068_v44  ;;  %419 = vmatprep.subr.bf16.mxu1 %v352_v11  ;;  %v337_v45 = vmul.f32 %v321_v13, %v1280_v26  ;;  %v322_v25 = vmul.f32 0.5, %v306_v17 }
 0x106   :  { %v311_v15 = vadd.f32 1.0, %v1070_v12  ;;  %420 = vmatpush1.bf16.msra.mxu1 %v351_v38  ;;  %v339_v21 = vmul.f32 %v323_v33, %v1282_v31  ;;  %v324_v43 = vmul.f32 0.5, %v308_v23  ;;  %v24_v23 = vld [vmem:[%s1584_s1 + $0x8] sm:$0xff] }
 0x107   :  { %v325_v16 = vmul.f32 0.5, %v309_v14  ;;  %v338_v46 = vmul.f32 %v322_v25, %v1286_v36  ;;  %v360_v36 = vpop.permute.xlu1 %359 }
 0x108   :  { %v327_v18 = vmul.f32 0.5, %v311_v15  ;;  %v340_v48 = vmul.f32 %v324_v43, %v1288_v37 }
 0x109   :  { %v341_v19 = vmul.f32 %v325_v16, %v1292_v41 }
 0x10a   :  { %v1072_v20 = vpop.eup %1071  ;;  %v343_v22 = vmul.f32 %v327_v18, %v1294_v42  ;;  %v1040_v42 = vld [vmem:[%s1585_s2 + $0x10] sm:$0xff]  }
 0x10b   :  { %v310_v24 = vadd.f32 1.0, %v1072_v20  ;;  %v353_v27 = vpack.c.bf16 %v341_v19, %v337_v45  ;;  %v23_v20 = vld [vmem:[%s1584_s1] sm:$0xff] }
 0x10c   :  { %v355_v30 = vpack.c.bf16 %v343_v22, %v339_v21 }
 0x10d   :  { %v1074_v34 = vpop.eup %1073  ;;  %v326_v35 = vmul.f32 0.5, %v310_v24 }
 0x10e   :  { %v312_v40 = vadd.f32 1.0, %v1074_v34 }
 0x10f   :  { %v342_v26 = vmul.f32 %v326_v35, %v1311_v60 }
 0x110   :  { %v328_v47 = vmul.f32 0.5, %v312_v40 }
 0x111   :  { %v354_v41 = vpack.c.bf16 %v342_v26, %v338_v46  ;;  %v26_v26 = vld [vmem:[%s1584_s1 + $0x18] sm:$0xff] }
 0x112   :  { %v344_v31 = vmul.f32 %v328_v47, %v1314_v0 }
 0x113   :  { %378 = vmatprep.subr.bf16.mxu0 %v354_v41 }
 0x114   :  { %v356_v49 = vpack.c.bf16 %v344_v31, %v340_v48  ;;  %379 = vmatpush1.bf16.msra.mxu0 %v353_v27  ;;  %v25_v27 = vld [vmem:[%s1584_s1 + $0x10] sm:$0xff] }
 0x116   :  { %421 = vmatprep.subr.bf16.mxu1 %v356_v49 }
 0x117   :  { %422 = vmatpush1.bf16.msra.mxu1 %v355_v30  ;;  %1016 = vmatmul.mubr.msk.bf16.vlgmr.msra.gmra.mrb[8].mxu0 %vm372_vm2, %v1040_v42 }
 0x118   :  { %576 = vmatprep.mubr.bf16.mxu0 %v1139_v6 }
 0x11a   :  { %1017 = vmatmul.mubr.msk.bf16.vlgmr.msra.gmra.mrb[8].mxu1 %vm372_vm2, %v1040_v42 }
 0x11b   :  { %629 = vmatprep.mubr.bf16.mxu1 %v1139_v6 }
 0x1ea   :  { %v410_v37 = vpop.f32.mrb[8].mxu0 }
 0x1eb   :  { %v1351_v60 = vadd.f32 %v410_v37, %v360_v36  ;;  %v412_v0 = vpop.f32.mrb[9].mxu0 }
 0x1ec   :  { %v1353_v51 = vadd.f32 %v412_v0, %v360_v36  ;;  %v414_v52 = vpop.f32.mrb[10].mxu0 }
 0x1ed   :  { %894 = vst [vmem:[%s1587_s4] sm:$0xff] %v1351_v60  ;;  %v453_v28 = vpop.f32.mrb[8].mxu1  ;;  %v415_v53 = vadd.f32 %v414_v52, %v365_v50  ;;  %v416_v54 = vpop.f32.mrb[11].mxu0  ;;  %v950_v55 = vmul.f32 %v1351_v60, %v1351_v60 }
 0x1ee   :  { %v1361_v56 = vadd.f32 %v453_v28, %v360_v36  ;;  %895 = vst [vmem:[%s1587_s4 + $0x8] sm:$0xff] %v1353_v51  ;;  %v455_v29 = vpop.f32.mrb[9].mxu1  ;;  %v417_v57 = vadd.f32 %v416_v54, %v365_v50  ;;  %v951_v1 = vmul.f32 %v1353_v51, %v1353_v51 }
 0x1ef   :  { %v1367_v58 = vadd.f32 %v455_v29, %v360_v36  ;;  %v462_v59 = vmul.f32 0.5, %v415_v53  ;;  %898 = vst [vmem:[%s1587_s4 + $0x20] sm:$0xff] %v415_v53  ;;  %v946_v61 = vadd.f32 1.0, %v415_v53  ;;  %v958_v62 = vmul.f32 1.442695, %v415_v53  ;;  %v457_v63 = vpop.f32.mrb[10].mxu1 }
 0x1f0   :  { %896 = vst [vmem:[%s1587_s4 + $0x10] sm:$0xff] %v1361_v56  ;;  %v458_v2 = vadd.f32 %v457_v63, %v365_v50  ;;  %v463_v3 = vmul.f32 0.5, %v417_v57  ;;  %899 = vst [vmem:[%s1587_s4 + $0x28] sm:$0xff] %v417_v57  ;;  %v947_v38 = vadd.f32 1.0, %v417_v57  ;;  %v459_v4 = vpop.f32.mrb[11].mxu1  ;;  %v952_v5 = vmul.f32 %v1361_v56, %v1361_v56  ;;  %v497_v63 = vpop.permute.xlu0 %496 }
 0x1f1   :  { %897 = vst [vmem:[%s1587_s4 + $0x18] sm:$0xff] %v1367_v58  ;;  %v466_v7 = vmul.f32 1.442695, %v462_v59  ;;  %1075 = vpow2.f32 %v958_v62  ;;  %v960_v8 = vmul.f32 1.442695, %v417_v57  ;;  %v460_v11 = vadd.f32 %v459_v4, %v365_v50  ;;  %v1042_v62 = vld [vmem:[%s1585_s2 + $0x20] sm:$0xff]  }
 0x1f2   :  { %v464_v39 = vmul.f32 0.5, %v458_v2  ;;  %900 = vst [vmem:[%s1587_s4 + $0x30] sm:$0xff] %v458_v2  ;;  %v948_v9 = vadd.f32 1.0, %v458_v2  ;;  %v962_v32 = vmul.f32 1.442695, %v458_v2  ;;  %v954_v44 = vsub.f32 %v946_v61, %v950_v55 }
 0x1f3   :  { %v468_v10 = vmul.f32 1.442695, %v463_v3  ;;  %1077 = vpow2.f32 %v466_v7  ;;  %v955_v12 = vsub.f32 %v947_v38, %v951_v1  ;;  %v953_v13 = vmul.f32 %v1367_v58, %v1367_v58  ;;  %901 = vst [vmem:[%s1587_s4 + $0x38] sm:$0xff] %v460_v11  ;;  %v502_v38 = vpop.permute.xlu1 %501 }
 0x1f4   :  { %v470_v14 = vmul.f32 1.442695, %v464_v39  ;;  %1079 = vpow2.f32 %v962_v32  ;;  %v956_v33 = vsub.f32 %v948_v9, %v952_v5  ;;  %v465_v15 = vmul.f32 0.5, %v460_v11 }
 0x1f5   :  { %1081 = vpow2.f32 %v468_v10  ;;  %v964_v16 = vmul.f32 1.442695, %v460_v11  ;;  %v949_v17 = vadd.f32 1.0, %v460_v11 }
 0x1f6   :  { %1083 = vpow2.f32 %v470_v14  ;;  %v472_v18 = vmul.f32 1.442695, %v465_v15 }
 0x1f7   :  { %1085 = vpow2.f32 %v960_v8  ;;  %v957_v45 = vsub.f32 %v949_v17, %v953_v13 }
 0x1f8   :  { %1087 = vpow2.f32 %v964_v16 }
 0x1f9   :  { %1089 = vpow2.f32 %v472_v18 }
 0x1fb   :  { %v1076_v19 = vpop.eup %1075 }
 0x1fc   :  { %v966_v21 = vsub.f32 %v954_v44, %v1076_v19 }
 0x1fd   :  { %v1078_v22 = vpop.eup %1077 }
 0x1fe   :  { %v1080_v24 = vpop.eup %1079  ;;  %v474_v25 = vmul.f32 %v1078_v22, %v23_v20  ;;  %v970_v49 = vmul.f32 -0.5, %v966_v21 }
 0x1ff   :  { %v1082_v30 = vpop.eup %1081  ;;  %v968_v34 = vsub.f32 %v956_v33, %v1080_v24 }
 0x200   :  { %v1084_v35 = vpop.eup %1083  ;;  %v475_v40 = vmul.f32 %v1082_v30, %v24_v23  ;;  %v478_v43 = vadd.f32 %v474_v25, %v1351_v60 }
 0x201   :  { %v1086_v46 = vpop.eup %1085  ;;  %v476_v47 = vmul.f32 %v1084_v35, %v25_v27  ;;  %v972_v54 = vmul.f32 -0.5, %v968_v34 }
 0x202   :  { %v1088_v41 = vpop.eup %1087  ;;  %v479_v48 = vadd.f32 %v475_v40, %v1353_v51  ;;  %v490_v31 = vpack.c.bf16 %v478_v43, %v478_v43  ;;  %902 = vst [vmem:[%s1587_s4 + $0x40] sm:$0xff] %v478_v43  ;;  %v967_v42 = vsub.f32 %v955_v12, %v1086_v46 }
 0x203   :  { %v1090_v36 = vpop.eup %1089  ;;  %v480_v37 = vadd.f32 %v476_v47, %v1361_v56  ;;  %v969_v60 = vsub.f32 %v957_v45, %v1088_v41  ;;  %v1041_v56 = vld [vmem:[%s1585_s2 + $0x18] sm:$0xff]  }
 0x204   :  { %v491_v0 = vpack.c.bf16 %v479_v48, %v479_v48  ;;  %903 = vst [vmem:[%s1587_s4 + $0x48] sm:$0xff] %v479_v48  ;;  %v477_v50 = vmul.f32 %v1090_v36, %v26_v26  ;;  %v533_v52 = vsel %vm531_vm3, %v490_v31, 0  ;;  %v971_v51 = vmul.f32 -0.5, %v967_v42 }
 0x205   :  { %v492_v28 = vpack.c.bf16 %v480_v37, %v480_v37  ;;  %904 = vst [vmem:[%s1587_s4 + $0x50] sm:$0xff] %v480_v37  ;;  %v973_v59 = vmul.f32 -0.5, %v969_v60 }
 0x206   :  { %1020 = vmatprep.subr.msk.bf16.mxu0 %vm531_vm3, %v491_v0  ;;  %v481_v53 = vadd.f32 %v477_v50, %v1367_v58  ;;  %v974_v55 = vadd.f32 %v971_v51, %v970_v49 }
 0x207   :  { %545 = vmatpush1.bf16.msra.mxu0 %v533_v52  ;;  %v539_v57 = vsel %vm531_vm3, %v492_v28, 0 }
 0x208   :  { %v493_v29 = vpack.c.bf16 %v481_v53, %v481_v53  ;;  %905 = vst [vmem:[%s1587_s4 + $0x58] sm:$0xff] %v481_v53  ;;  %v975_v61 = vadd.f32 %v974_v55, %v972_v54  ;;  %v507_v54 = vpop.permute.xlu0 %506 }
 0x20a   :  { %1023 = vmatprep.subr.msk.bf16.mxu1 %vm531_vm3, %v493_v29  ;;  %v976_v58 = vadd.f32 %v975_v61, %v973_v59  ;;  %1021 = vmatmul.mubr.msk.bf16.vlgmr.msra.gmra.mrb[12].mxu0 %vm524_vm4, %v1041_v56 }
 0x20b   :  { %598 = vmatpush1.bf16.msra.mxu1 %v539_v57  ;;  %586 = vmatprep.mubr.bf16.mxu0 %v1139_v6 }
 0x20c   :  { %977 = vadd.xlane.f32.xlu0 %v976_v58 }
 0x20e   :  { %1024 = vmatmul.mubr.msk.bf16.vlgmr.msra.gmra.mrb[12].mxu1 %vm524_vm4, %v1041_v56 }
 0x20f   :  { %639 = vmatprep.mubr.bf16.mxu1 %v1139_v6 }
 0x212   :  { %1022 = vmatmul.mubr.msk.bf16.gmra.mrb[16].mxu0 %vm524_vm4, %v1042_v62 }
 0x213   :  { %844 = vmatprep.mubr.bf16.mxu0 %v1139_v6 }
 0x216   :  { %1025 = vmatmul.mubr.msk.bf16.gmra.mrb[16].mxu1 %vm524_vm4, %v1042_v62 }
 0x217   :  { %885 = vmatprep.mubr.bf16.mxu1 %v1139_v6 }
 0x2dd   :  { %v578_v1 = vpop.f32.mrb[12].mxu0 }
 0x2de   :  { %v1441_v2 = vadd.f32 %v578_v1, %v497_v63  ;;  %v580_v3 = vpop.f32.mrb[13].mxu0 }
 0x2df   :  { %v1443_v4 = vadd.f32 %v580_v3, %v497_v63  ;;  %v582_v5 = vpop.f32.mrb[14].mxu0 }
 0x2e0   :  { %v650_v7 = vmul.f32 %v1441_v2, %v1441_v2  ;;  %v1447_v8 = vadd.f32 %v582_v5, %v502_v38  ;;  %v584_v39 = vpop.f32.mrb[15].mxu0 }
 0x2e1   :  { %v631_v9 = vpop.f32.mrb[12].mxu1  ;;  %v651_v32 = vmul.f32 %v1443_v4, %v1443_v4  ;;  %v1451_v6 = vadd.f32 %v584_v39, %v502_v38  ;;  %v512_v39 = vpop.permute.xlu1 %511 }
 0x2e2   :  { %v666_v10 = vmul.f32 %v650_v7, %v1441_v2  ;;  %v1454_v11 = vadd.f32 %v631_v9, %v497_v63  ;;  %v633_v44 = vpop.f32.mrb[13].mxu1  ;;  %v654_v12 = vmul.f32 %v1447_v8, %v1447_v8 }
 0x2e3   :  { %v667_v13 = vmul.f32 %v651_v32, %v1443_v4  ;;  %v1459_v14 = vadd.f32 %v633_v44, %v497_v63  ;;  %v635_v33 = vpop.f32.mrb[14].mxu1  ;;  %v655_v15 = vmul.f32 %v1451_v6, %v1451_v6 }
 0x2e4   :  { %v682_v16 = vmul.f32 0.044715, %v666_v10  ;;  %v652_v17 = vmul.f32 %v1454_v11, %v1454_v11  ;;  %v670_v18 = vmul.f32 %v654_v12, %v1447_v8  ;;  %v1466_v45 = vadd.f32 %v635_v33, %v502_v38  ;;  %v637_v19 = vpop.f32.mrb[15].mxu1 }
 0x2e5   :  { %v683_v20 = vmul.f32 0.044715, %v667_v13  ;;  %v653_v21 = vmul.f32 %v1459_v14, %v1459_v14  ;;  %v671_v22 = vmul.f32 %v655_v15, %v1451_v6  ;;  %v1471_v23 = vadd.f32 %v637_v19, %v502_v38  ;;  %v588_v24 = vpop.f32.mrb[16].mxu0 }
 0x2e6   :  { %v698_v25 = vadd.f32 %v682_v16, %v1441_v2  ;;  %v668_v27 = vmul.f32 %v652_v17, %v1454_v11  ;;  %v686_v30 = vmul.f32 0.044715, %v670_v18  ;;  %v656_v34 = vmul.f32 %v1466_v45, %v1466_v45  ;;  %v590_v35 = vpop.f32.mrb[17].mxu0 }
 0x2e7   :  { %v699_v40 = vadd.f32 %v683_v20, %v1443_v4  ;;  %v669_v43 = vmul.f32 %v653_v21, %v1459_v14  ;;  %v687_v46 = vmul.f32 0.044715, %v671_v22  ;;  %v657_v26 = vmul.f32 %v1471_v23, %v1471_v23  ;;  %v592_v47 = vpop.f32.mrb[18].mxu0 }
 0x2e8   :  { %v714_v41 = vmul.f32 0.7978846, %v698_v25  ;;  %v684_v48 = vmul.f32 0.044715, %v668_v27  ;;  %v702_v31 = vadd.f32 %v686_v30, %v1447_v8  ;;  %v672_v42 = vmul.f32 %v656_v34, %v1466_v45  ;;  %v594_v49 = vpop.f32.mrb[19].mxu0 }
 0x2e9   :  { %v715_v36 = vmul.f32 0.7978846, %v699_v40  ;;  %v685_v37 = vmul.f32 0.044715, %v669_v43  ;;  %v703_v60 = vadd.f32 %v687_v46, %v1451_v6  ;;  %v673_v0 = vmul.f32 %v657_v26, %v1471_v23  ;;  %v641_v50 = vpop.f32.mrb[16].mxu1 }
 0x2ea   :  { %1091 = vtanh.f32 %v714_v41  ;;  %v700_v52 = vadd.f32 %v684_v48, %v1454_v11  ;;  %v718_v51 = vmul.f32 0.7978846, %v702_v31  ;;  %v688_v28 = vmul.f32 0.044715, %v672_v42  ;;  %v643_v53 = vpop.f32.mrb[17].mxu1 }
 0x2eb   :  { %1093 = vtanh.f32 %v715_v36  ;;  %v701_v55 = vadd.f32 %v685_v37, %v1459_v14  ;;  %v719_v56 = vmul.f32 0.7978846, %v703_v60  ;;  %v689_v29 = vmul.f32 0.044715, %v673_v0  ;;  %v645_v57 = vpop.f32.mrb[18].mxu1 }
 0x2ec   :  { %v716_v59 = vmul.f32 0.7978846, %v700_v52  ;;  %1095 = vtanh.f32 %v718_v51  ;;  %v704_v61 = vadd.f32 %v688_v28, %v1466_v45  ;;  %v1488_v58 = vadd.f32 %v588_v24, %v507_v54  ;;  %v647_v62 = vpop.f32.mrb[19].mxu1 }
 0x2ed   :  { %v717_v63 = vmul.f32 0.7978846, %v701_v55  ;;  %1097 = vtanh.f32 %v719_v56  ;;  %v705_v1 = vadd.f32 %v689_v29, %v1471_v23  ;;  %v1491_v3 = vadd.f32 %v641_v50, %v507_v54 }
 0x2ee   :  { %1099 = vtanh.f32 %v716_v59  ;;  %v720_v38 = vmul.f32 0.7978846, %v704_v61  ;;  %v658_v5 = vmul.f32 %v1488_v58, %v1488_v58  ;;  %v1495_v7 = vadd.f32 %v590_v35, %v507_v54 }
 0x2ef   :  { %1101 = vtanh.f32 %v717_v63  ;;  %v721_v9 = vmul.f32 0.7978846, %v705_v1  ;;  %v660_v32 = vmul.f32 %v1491_v3, %v1491_v3  ;;  %v1499_v10 = vadd.f32 %v643_v53, %v507_v54 }
 0x2f0   :  { %1103 = vtanh.f32 %v720_v38  ;;  %v674_v44 = vmul.f32 %v658_v5, %v1488_v58  ;;  %v659_v12 = vmul.f32 %v1495_v7, %v1495_v7  ;;  %v1504_v13 = vadd.f32 %v592_v47, %v512_v39 }
 0x2f1   :  { %1105 = vtanh.f32 %v721_v9  ;;  %v676_v33 = vmul.f32 %v660_v32, %v1491_v3  ;;  %v661_v15 = vmul.f32 %v1499_v10, %v1499_v10  ;;  %v1509_v16 = vadd.f32 %v645_v57, %v512_v39 }
 0x2f2   :  { %v690_v17 = vmul.f32 0.044715, %v674_v44  ;;  %v675_v18 = vmul.f32 %v659_v12, %v1495_v7  ;;  %v662_v19 = vmul.f32 %v1504_v13, %v1504_v13  ;;  %v1514_v20 = vadd.f32 %v594_v49, %v512_v39 }
 0x2f3   :  { %v692_v21 = vmul.f32 0.044715, %v676_v33  ;;  %v677_v22 = vmul.f32 %v661_v15, %v1499_v10  ;;  %v664_v24 = vmul.f32 %v1509_v16, %v1509_v16  ;;  %v1519_v25 = vadd.f32 %v647_v62, %v512_v39 }
 0x2f4   :  { %v1092_v27 = vpop.eup %1091  ;;  %v706_v30 = vadd.f32 %v690_v17, %v1488_v58  ;;  %v691_v34 = vmul.f32 0.044715, %v675_v18  ;;  %v678_v35 = vmul.f32 %v662_v19, %v1504_v13  ;;  %v663_v40 = vmul.f32 %v1514_v20, %v1514_v20 }
 0x2f5   :  { %v1094_v43 = vpop.eup %1093  ;;  %v746_v46 = vadd.f32 1.0, %v1092_v27  ;;  %v708_v26 = vadd.f32 %v692_v21, %v1491_v3  ;;  %v693_v47 = vmul.f32 0.044715, %v677_v22  ;;  %v680_v41 = vmul.f32 %v664_v24, %v1509_v16 }
 0x2f6   :  { %v1096_v48 = vpop.eup %1095  ;;  %v722_v31 = vmul.f32 0.7978846, %v706_v30  ;;  %v707_v42 = vadd.f32 %v691_v34, %v1495_v7  ;;  %v694_v49 = vmul.f32 0.044715, %v678_v35  ;;  %v679_v36 = vmul.f32 %v663_v40, %v1514_v20 }
 0x2f7   :  { %v1098_v37 = vpop.eup %1097  ;;  %v762_v60 = vmul.f32 0.5, %v746_v46  ;;  %v750_v0 = vadd.f32 1.0, %v1096_v48  ;;  %v724_v50 = vmul.f32 0.7978846, %v708_v26  ;;  %v709_v52 = vadd.f32 %v693_v47, %v1499_v10 }
 0x2f8   :  { %v1100_v51 = vpop.eup %1099  ;;  %1107 = vtanh.f32 %v722_v31  ;;  %v723_v28 = vmul.f32 0.7978846, %v707_v42  ;;  %v710_v53 = vadd.f32 %v694_v49, %v1504_v13  ;;  %v696_v54 = vmul.f32 0.044715, %v680_v41 }
 0x2f9   :  { %v1102_v55 = vpop.eup %1101  ;;  %v748_v56 = vadd.f32 1.0, %v1100_v51  ;;  %v766_v29 = vmul.f32 0.5, %v750_v0  ;;  %1109 = vtanh.f32 %v724_v50  ;;  %v778_v59 = vmul.f32 %v762_v60, %v1441_v2 }
 0x2fa   :  { %v1104_v57 = vpop.eup %1103  ;;  %1111 = vtanh.f32 %v723_v28  ;;  %v726_v61 = vmul.f32 0.7978846, %v710_v53  ;;  %v712_v62 = vadd.f32 %v696_v54, %v1509_v16  ;;  %v725_v5 = vmul.f32 0.7978846, %v709_v52 }
 0x2fb   :  { %v1106_v63 = vpop.eup %1105  ;;  %v764_v1 = vmul.f32 0.5, %v748_v56  ;;  %v752_v38 = vadd.f32 1.0, %v1104_v57  ;;  %v695_v39 = vmul.f32 0.044715, %v679_v36  ;;  %v782_v9 = vmul.f32 %v766_v29, %v1447_v8 }
 0x2fc   :  { %v728_v32 = vmul.f32 0.7978846, %v712_v62  ;;  %v665_v44 = vmul.f32 %v1519_v25, %v1519_v25  ;;  %v747_v12 = vadd.f32 1.0, %v1094_v43  ;;  %1113 = vtanh.f32 %v726_v61 }
 0x2fd   :  { %v780_v33 = vmul.f32 %v764_v1, %v1454_v11  ;;  %v768_v15 = vmul.f32 0.5, %v752_v38  ;;  %v711_v2 = vadd.f32 %v695_v39, %v1514_v20  ;;  %v751_v18 = vadd.f32 1.0, %v1098_v37 }
 0x2fe   :  { %1115 = vtanh.f32 %v728_v32  ;;  %v681_v17 = vmul.f32 %v665_v44, %v1519_v25  ;;  %v763_v19 = vmul.f32 0.5, %v747_v12  ;;  %v749_v8 = vadd.f32 1.0, %v1102_v55 }
 0x2ff   :  { %v784_v21 = vmul.f32 %v768_v15, %v1466_v45  ;;  %v727_v22 = vmul.f32 0.7978846, %v711_v2  ;;  %v753_v24 = vadd.f32 1.0, %v1106_v63  ;;  %1117 = vtanh.f32 %v725_v5 }
 0x300   :  { %v697_v27 = vmul.f32 0.044715, %v681_v17  ;;  %v767_v30 = vmul.f32 0.5, %v751_v18  ;;  %v796_v34 = vpack.c.bf16 %v782_v9, %v778_v59  ;;  %v765_v11 = vmul.f32 0.5, %v749_v8 }
 0x301   :  { %1119 = vtanh.f32 %v727_v22  ;;  %v769_v35 = vmul.f32 0.5, %v753_v24  ;;  %v798_v40 = vpack.c.bf16 %v784_v21, %v780_v33  ;;  %v779_v26 = vmul.f32 %v763_v19, %v1443_v4  ;;  %v1123_v22 = vld [vmem:[%s1583_s0] sm:$0xff] }
 0x302   :  { %v1108_v43 = vpop.eup %1107  ;;  %v713_v46 = vadd.f32 %v697_v27, %v1519_v25  ;;  %v783_v47 = vmul.f32 %v767_v30, %v1451_v6  ;;  %v781_v45 = vmul.f32 %v765_v11, %v1459_v14 }
 0x303   :  { %v1110_v41 = vpop.eup %1109  ;;  %v785_v48 = vmul.f32 %v769_v35, %v1471_v23  ;;  %v754_v42 = vadd.f32 1.0, %v1108_v43  ;;  %v1124_v43 = vld [vmem:[%s1583_s0 + $0x8] sm:$0xff] }
 0x304   :  { %v1112_v31 = vpop.eup %1111  ;;  %v729_v49 = vmul.f32 0.7978846, %v713_v46  ;;  %v797_v36 = vpack.c.bf16 %v783_v47, %v779_v26  ;;  %v756_v37 = vadd.f32 1.0, %v1110_v41 }
 0x305   :  { %v799_v60 = vpack.c.bf16 %v785_v48, %v781_v45  ;;  %v770_v4 = vmul.f32 0.5, %v754_v42  ;;  %v755_v6 = vadd.f32 1.0, %v1112_v31 }
 0x306   :  { %1121 = vtanh.f32 %v729_v49  ;;  %812 = vmatprep.subr.bf16.mxu0 %v797_v36  ;;  %v1114_v0 = vpop.eup %1113  ;;  %v772_v51 = vmul.f32 0.5, %v756_v37 }
 0x307   :  { %853 = vmatprep.subr.bf16.mxu1 %v799_v60  ;;  %813 = vmatpush1.bf16.msra.mxu0 %v796_v34  ;;  %v758_v52 = vadd.f32 1.0, %v1114_v0  ;;  %v786_v55 = vmul.f32 %v770_v4, %v1488_v58  ;;  %v771_v57 = vmul.f32 0.5, %v755_v6 }
 0x308   :  { %v1116_v50 = vpop.eup %1115  ;;  %854 = vmatpush1.bf16.msra.mxu1 %v798_v40  ;;  %v788_v59 = vmul.f32 %v772_v51, %v1491_v3 }
 0x309   :  { %v760_v14 = vadd.f32 1.0, %v1116_v50  ;;  %v1118_v28 = vpop.eup %1117  ;;  %v774_v23 = vmul.f32 0.5, %v758_v52  ;;  %v787_v39 = vmul.f32 %v771_v57, %v1495_v7  ;;  %v807_v7 = vpop.permute.xlu0 %806 }
 0x30a   :  { %v757_v62 = vadd.f32 1.0, %v1118_v28 }
 0x30b   :  { %v1120_v53 = vpop.eup %1119  ;;  %v776_v54 = vmul.f32 0.5, %v760_v14  ;;  %v790_v56 = vmul.f32 %v774_v23, %v1504_v13 }
 0x30c   :  { %v759_v29 = vadd.f32 1.0, %v1120_v53  ;;  %v773_v44 = vmul.f32 0.5, %v757_v62 }
 0x30d   :  { %v792_v61 = vmul.f32 %v776_v54, %v1509_v16  ;;  %v800_v1 = vpack.c.bf16 %v790_v56, %v786_v55  ;;  %v794_v16 = vld [vmem:[%s1585_s2 + $0x28] sm:$0x3]  ;;  %v978_v37 = vpop.xlane.xlu0 %977 }
 0x30e   :  { %v775_v63 = vmul.f32 0.5, %v759_v29  ;;  %v789_v13 = vmul.f32 %v773_v44, %v1499_v10  ;;  %v979_v60 = vrot.slane %v978_v37, 4 }
 0x30f   :  { %v802_v38 = vpack.c.bf16 %v792_v61, %v788_v59 }
 0x310   :  { %v1122_v5 = vpop.eup %1121  ;;  %v791_v9 = vmul.f32 %v775_v63, %v1514_v20  ;;  %v980_v0 = vadd.f32 %v979_v60, %v978_v37 }
 0x311   :  { %v761_v32 = vadd.f32 1.0, %v1122_v5 }
 0x312   :  { %v801_v58 = vpack.c.bf16 %v791_v9, %v787_v39  ;;  %v981_v50 = vrot.slane %v980_v0, 2 }
 0x313   :  { %v777_v12 = vmul.f32 0.5, %v761_v32 }
 0x314   :  { %814 = vmatprep.subr.bf16.mxu0 %v801_v58  ;;  %v982_v51 = vadd.f32 %v981_v50, %v980_v0 }
 0x315   :  { %v793_v3 = vmul.f32 %v777_v12, %v1519_v25  ;;  %815 = vmatpush1.bf16.msra.mxu0 %v800_v1 }
 0x316   :  { %v983_v23 = vrot.slane %v982_v51, 1 }
 0x317   :  { %v803_v33 = vpack.c.bf16 %v793_v3, %v789_v13 }
 0x318   :  { %1026 = vmatmul.mubr.msk.bf16.vlgmr.msra.gmra.mrb[20].mxu0 %vm372_vm2, %v794_v16  ;;  %v984_v55 = vadd.f32 %v983_v23, %v982_v51 }
 0x319   :  { %855 = vmatprep.subr.bf16.mxu1 %v803_v33 }
 0x31a   :  { %856 = vmatpush1.bf16.msra.mxu1 %v802_v38 }
 0x31d   :  { %1027 = vmatmul.mubr.msk.bf16.vlgmr.msra.gmra.mrb[20].mxu1 %vm372_vm2, %v794_v16 }
 0x3eb   :  { %v846_v20 = vpop.f32.mrb[20].mxu0 }
 0x3ec   :  { %v847_v15 = vadd.f32 %v846_v20, %v807_v7  ;;  %v848_v2 = vpop.f32.mrb[21].mxu0 }
 0x3ed   :  { %v849_v17 = vadd.f32 %v848_v2, %v807_v7  ;;  %v850_v10 = vpop.f32.mrb[22].mxu0 }
 0x3ee   :  { %906 = vst [vmem:[%s1587_s4 + $0x60] sm:$0xf] %v847_v15  ;;  %v851_v25 = vpop.f32.mrb[23].mxu0 }
 0x3ef   :  { %907 = vst [vmem:[%s1587_s4 + $0x68] sm:$0xf] %v849_v17  ;;  %v914_v18 = vcombine.low %v847_v15, %v849_v17 }
 0x3f0   :  { %v887_v19 = vpop.f32.mrb[20].mxu1 }
 0x3f1   :  { %v888_v21 = vadd.f32 %v887_v19, %v807_v7  ;;  %v918_v8 = vsub.f32 %v1123_v22, %v914_v18  ;;  %v889_v24 = vpop.f32.mrb[21].mxu1 }
 0x3f2   :  { %v890_v27 = vadd.f32 %v889_v24, %v807_v7  ;;  %v891_v30 = vpop.f32.mrb[22].mxu1 }
 0x3f3   :  { %908 = vst [vmem:[%s1587_s4 + $0x70] sm:$0xf] %v888_v21  ;;  %v920_v34 = vmul.f32 %v918_v8, %v918_v8  ;;  %v892_v11 = vpop.f32.mrb[23].mxu1 }
 0x3f4   :  { %909 = vst [vmem:[%s1587_s4 + $0x78] sm:$0xf] %v890_v27  ;;  %v915_v35 = vcombine.low %v888_v21, %v890_v27 }
 0x3f5   :  { %v924_v40 = vcombine.high %v920_v34, %v920_v34  ;;  %v928_v26 = vsel %vm531_vm3, %v920_v34, 0.0 }
 0x3f6   :  { %v919_v46 = vsub.f32 %v1124_v43, %v915_v35 }
 0x3f7   :  { %v929_v47 = vsel %vm531_vm3, %v924_v40, 0.0 }
 0x3f8   :  { %v921_v41 = vmul.f32 %v919_v46, %v919_v46  ;;  %v930_v45 = vadd.f32 %v929_v47, %v928_v26 }
 0x3fa   :  { %v925_v48 = vcombine.high %v921_v41, %v921_v41  ;;  %v931_v31 = vsel %vm531_vm3, %v921_v41, 0.0 }
 0x3fb   :  { %v932_v42 = vadd.f32 %v931_v31, %v930_v45 }
 0x3fc   :  { %v933_v49 = vsel %vm531_vm3, %v925_v48, 0.0 }
 0x3fd   :  { %v934_v36 = vadd.f32 %v933_v49, %v932_v42 }
 0x3ff   :  { %935 = vadd.xlane.f32.xlu1 %v934_v36 }
 0x48c   :  { %v936_v4 = vpop.xlane.xlu1 %935 }
 0x48d   :  { %v937_v52 = vrot.slane %v936_v4, 4 }
 0x48f   :  { %v938_v6 = vadd.f32 %v937_v52, %v936_v4 }
 0x491   :  { %v939_v14 = vrot.slane %v938_v6, 2 }
 0x493   :  { %v940_v28 = vadd.f32 %v939_v14, %v938_v6 }
 0x495   :  { %v941_v53 = vrot.slane %v940_v28, 1 }
 0x497   :  { %v942_v54 = vadd.f32 %v941_v53, %v940_v28 }
 0x499   :  { %1028 = vpush %v942_v54 }
 0x49a   :  { %1030 = vpush %v984_v55 }
 0x4ca   :  { %s1029_s22 = spop %1028 }
 0x4cb   :  { %945 = sst [smem:[#allocation2]] %s1029_s22  ;;  %s1031_s3 = spop %1030 }
 0x4cc   :  { %987 = sst [smem:[#allocation2 + $0x1]] %s1031_s3 }
 0x4cd   :  { %1136 = shalt.err (!%p1133_p4)
}
 0x4ce   :  { %s1140_s24 = smov [#allocation2]  }
 0x4cf   :  { %999 = dma.smem_to_vmem %s1140_s24, 16, %s997_s21, [#allocation3]  }
 0x4d0   :  { %1137 = dma.done.wait [#allocation3], 16  }
 0x4d1   :  { %1138 = vsyncadd [#allocation3], 4294967280 }
 0x4d2   :  { %1005 = sfence }
 0x4d3   :  { %1006 = vsyncpa [#allocation3], 1 }

</bundles_post_ra>
